<compile_context>
chip_gen: v7x
topology: tpu7x:2x2x1
jax: 0.10.0
libtpu: 0.0.40
codegen_flags: <defaults>
</compile_context>

<pallas_src>
import functools

import jax
import jax.numpy as jnp
from jax.experimental import pallas as pl
from jax.experimental.pallas import tpu as pltpu


def _round_up(x: int, m: int) -> int:
    return ((x + m - 1) // m) * m


def _fold_lanes_to_128(x):
    """Sum a (rows, 128*2**k) f32 array down to (rows, 128) with lane-tile-
    aligned halving adds: pure VALU work, no cross-lane (XLU) reduction."""
    w = x.shape[1]
    while w > 128:
        h = w // 2
        x = x[:, :h] + x[:, h:w]
        w = h
    return x


def _emit_tile_dice(i, inter, denom, out_ref, *, tr, r_valid, need_row_mask):
    """Per-row dice -> masked -> per-tile sum, written as an aligned slab."""
    smooth = jnp.float32(1.0)
    dice = (2.0 * inter + smooth) / (denom + smooth)          # (tr, 1)
    if need_row_mask:
        # Ragged last R tile: padded rows hold garbage -> drop via select
        # (NaN/Inf safe, select does not propagate the unselected branch).
        row = i * tr + jax.lax.broadcasted_iota(jnp.int32, (tr, 1), 0)
        dice = jnp.where(row < r_valid, dice, 0.0)
    tile_sum = jnp.sum(dice).astype(jnp.float32)
    # (1, 8, 128) output block is fully (8,128)-aligned -> unmasked store.
    out_ref[...] = jnp.broadcast_to(tile_sum, out_ref.shape)


def _dice_kernel(pred_ref, target_ref, out_ref, inter_ref, denom_ref, *,
                 tr, lb, r_valid, l_valid, grid_l,
                 need_row_mask, need_lane_mask):
    i = pl.program_id(0)    # R tile index (parallel)

    if grid_l == 1:
        # Full rows fit one block: single pass, no scratch accumulation.
        p = pred_ref[...].astype(jnp.float32)
        t = target_ref[...].astype(jnp.float32)
        inter = jnp.sum(p * t, axis=1, keepdims=True)          # (tr, 1)
        denom = jnp.sum(p + t, axis=1, keepdims=True)          # fused marginals
        _emit_tile_dice(i, inter, denom, out_ref, tr=tr, r_valid=r_valid,
                        need_row_mask=need_row_mask)
        return

    li = pl.program_id(1)   # L tile index (reduction, innermost)

    @pl.when(li == 0)
    def _():
        inter_ref[...] = jnp.zeros_like(inter_ref)
        denom_ref[...] = jnp.zeros_like(denom_ref)

    p = pred_ref[...].astype(jnp.float32)    # (tr, lb)
    t = target_ref[...].astype(jnp.float32)  # (tr, lb)

    if need_lane_mask:
        # Ragged last L tile: discard garbage lanes with a select (NaN-safe).
        col = li * lb + jax.lax.broadcasted_iota(jnp.int32, (tr, lb), 1)
        lane_ok = col < l_valid
        p = jnp.where(lane_ok, p, 0.0)
        t = jnp.where(lane_ok, t, 0.0)

    # Lane-wide accumulation: keep the XLU cross-lane reduce out of the
    # per-L-step dependence chain (done once in the epilogue instead).
    inter_ref[...] += _fold_lanes_to_128(p * t)                # (tr, 128)
    denom_ref[...] += _fold_lanes_to_128(p + t)                # (tr, 128)

    @pl.when(li == grid_l - 1)
    def _():
        inter = jnp.sum(inter_ref[...], axis=1, keepdims=True)  # (tr, 1)
        denom = jnp.sum(denom_ref[...], axis=1, keepdims=True)  # (tr, 1)
        _emit_tile_dice(i, inter, denom, out_ref, tr=tr, r_valid=r_valid,
                        need_row_mask=need_row_mask)


def dice_loss(pred: jax.Array, target: jax.Array, *,
              block_budget_bytes: int = 2 << 20) -> jax.Array:
    """Pallas equivalent of DiceLoss.forward for NCHW inputs."""
    assert pred.shape == target.shape and pred.ndim == 4
    n, c, h, w = pred.shape
    r = n * c
    l = h * w

    # Flatten to (R, L); contiguous reshape, no data movement, no padding.
    p2 = pred.reshape(r, l)
    t2 = target.reshape(r, l)

    # ---- block sizing by a per-input VMEM byte budget ------------------------
    itemsize = max(jnp.dtype(pred.dtype).itemsize,
                   jnp.dtype(target.dtype).itemsize)
    budget_elems = max(128, block_budget_bytes // itemsize)

    # R (sublane) tile: a multiple of 8 or the full dim; aim for >= 2 R tiles
    # whenever r >= 16 so the parallel axis keeps both v7x TensorCores busy.
    TR_CAP = 256
    if r < 16:
        tr = r
    else:
        tr = min(TR_CAP, _round_up(-(-r // 2), 8))
    grid_r = pl.cdiv(r, tr)

    # L (lane) tile: full rows if they fit the budget (one contiguous DMA per
    # block); otherwise the largest 128 * 2^k chunk that fits the budget.
    budget_lanes = max(128, (budget_elems // tr) // 128 * 128)
    if l <= budget_lanes:
        lb = l
        grid_l = 1
    else:
        lb = 128
        while lb * 2 <= budget_lanes:
            lb *= 2
        grid_l = pl.cdiv(l, lb)

    need_row_mask = (r % tr) != 0
    need_lane_mask = (l % lb) != 0

    kernel = functools.partial(
        _dice_kernel,
        tr=tr, lb=lb, r_valid=r, l_valid=l, grid_l=grid_l,
        need_row_mask=need_row_mask, need_lane_mask=need_lane_mask,
    )

    # Per-R-tile partial dice sums (aligned (1,8,128) slabs); final mean in JAX
    # so the R axis can be sharded across TensorCores.
    partial = pl.pallas_call(
        kernel,
        out_shape=jax.ShapeDtypeStruct((grid_r, 8, 128), jnp.float32),
        grid=(grid_r, grid_l),
        in_specs=[
            pl.BlockSpec((tr, lb), lambda i, li: (i, li)),
            pl.BlockSpec((tr, lb), lambda i, li: (i, li)),
        ],
        out_specs=pl.BlockSpec((1, 8, 128), lambda i, li: (i, 0, 0)),
        scratch_shapes=[
            pltpu.VMEM((tr, 128), jnp.float32),   # running per-row intersection
            pltpu.VMEM((tr, 128), jnp.float32),   # running per-row pred+target
        ],
        compiler_params=pltpu.CompilerParams(
            dimension_semantics=("parallel", "arbitrary"),
            vmem_limit_bytes=32 * 1024 * 1024,
        ),
    )(p2, t2)

    return 1.0 - jnp.sum(partial[:, 0, 0]) / jnp.float32(r)


def dice_loss_ref(pred: jax.Array, target: jax.Array) -> jax.Array:
    """Pure-JAX reference matching the PyTorch module exactly."""
    smooth = 1.0
    intersection = (pred * target).sum(axis=2).sum(axis=2)
    dice = (2.0 * intersection + smooth) / (
        pred.sum(axis=2).sum(axis=2) + target.sum(axis=2).sum(axis=2) + smooth
    )
    return 1.0 - dice.mean()


if __name__ == "__main__":
    key = jax.random.PRNGKey(0)
    k1, k2, k3, k4 = jax.random.split(key, 4)

    # Small NCHW shapes: batch=2, channels=4, spatial=16x16 (single-block path).
    pred = jax.nn.sigmoid(jax.random.normal(k1, (2, 4, 16, 16), dtype=jnp.float32))
    target = (jax.random.uniform(k2, (2, 4, 16, 16)) > 0.5).astype(jnp.float32)

    loss = jax.block_until_ready(dice_loss(pred, target))
    ref = jax.block_until_ready(dice_loss_ref(pred, target))
    assert jnp.allclose(loss, ref, rtol=1e-5, atol=1e-5), (loss, ref)

    # Second case with a tiny block budget to exercise the tiled-L path
    # (lane-wide accumulators, ragged R/L masking, multi-tile parallel R axis).
    pred2 = jax.nn.sigmoid(jax.random.normal(k3, (2, 9, 24, 24), dtype=jnp.float32))
    target2 = (jax.random.uniform(k4, (2, 9, 24, 24)) > 0.5).astype(jnp.float32)

    loss2 = jax.block_until_ready(dice_loss(pred2, target2, block_budget_bytes=16384))
    ref2 = jax.block_until_ready(dice_loss_ref(pred2, target2))
    assert jnp.allclose(loss2, ref2, rtol=1e-5, atol=1e-5), (loss2, ref2)

    print("KERNEL_OK")
</pallas_src>

<mosaic_0001>
module attributes {stable_mosaic.version = 11 : i64} {
  func.func @_dice_kernel(%arg0: i32, %arg1: i32, %arg2: memref<8x256xf32, #tpu.memory_space<vmem>>, %arg3: memref<8x256xf32, #tpu.memory_space<vmem>>, %arg4: memref<1x8x128xf32, #tpu.memory_space<vmem>>, %arg5: memref<8x128xf32, #tpu.memory_space<vmem>>, %arg6: memref<8x128xf32, #tpu.memory_space<vmem>>) attributes {dimension_semantics = [#tpu.dimension_semantics<parallel>, #tpu.dimension_semantics<arbitrary>], iteration_bounds = array<i64: 1, 1>, scalar_prefetch = 0 : i64, scratch_operands = 2 : i64, tpu.core_type = #tpu.core_type<tc>, window_params = [{transform_indices = @transform_0, window_bounds = array<i64: 8, 256>}, {transform_indices = @transform_1, window_bounds = array<i64: 8, 256>}, {transform_indices = @transform_2, window_bounds = array<i64: 1, 8, 128>}]} {
    %c0 = arith.constant 0 : index
    %c0_0 = arith.constant 0 : index
    %0 = vector.load %arg2[%c0, %c0_0] : memref<8x256xf32, #tpu.memory_space<vmem>>, vector<8x256xf32>
    %c0_1 = arith.constant 0 : index
    %c0_2 = arith.constant 0 : index
    %1 = vector.load %arg3[%c0_1, %c0_2] : memref<8x256xf32, #tpu.memory_space<vmem>>, vector<8x256xf32>
    %2 = arith.mulf %0, %1 : vector<8x256xf32>
    %cst = arith.constant dense<0.000000e+00> : vector<8xf32>
    %3 = vector.multi_reduction <add>, %2, %cst [1] : vector<8x256xf32> to vector<8xf32>
    %4 = vector.shape_cast %3 : vector<8xf32> to vector<8x1xf32>
    %5 = arith.addf %0, %1 : vector<8x256xf32>
    %cst_3 = arith.constant dense<0.000000e+00> : vector<8xf32>
    %6 = vector.multi_reduction <add>, %5, %cst_3 [1] : vector<8x256xf32> to vector<8xf32>
    %7 = vector.shape_cast %6 : vector<8xf32> to vector<8x1xf32>
    %cst_4 = arith.constant 2.000000e+00 : f32
    %8 = vector.broadcast %cst_4 : f32 to vector<8x1xf32>
    %9 = arith.mulf %8, %4 : vector<8x1xf32>
    %cst_5 = arith.constant 1.000000e+00 : f32
    %10 = vector.broadcast %cst_5 : f32 to vector<8x1xf32>
    %11 = arith.addf %9, %10 : vector<8x1xf32>
    %cst_6 = arith.constant 1.000000e+00 : f32
    %12 = vector.broadcast %cst_6 : f32 to vector<8x1xf32>
    %13 = arith.addf %7, %12 : vector<8x1xf32>
    %14 = arith.divf %11, %13 : vector<8x1xf32>
    %15 = vector.shape_cast %14 : vector<8x1xf32> to vector<1x8x1xf32>
    %cst_7 = arith.constant dense<0.000000e+00> : vector<1xf32>
    %16 = vector.multi_reduction <add>, %15, %cst_7 [1, 2] : vector<1x8x1xf32> to vector<1xf32>
    %17 = vector.shape_cast %16 : vector<1xf32> to vector<1x1x1xf32>
    %18 = vector.extract %17[0, 0, 0] : f32 from vector<1x1x1xf32>
    %19 = vector.broadcast %18 : f32 to vector<1x8x128xf32>
    %c0_8 = arith.constant 0 : index
    %c0_9 = arith.constant 0 : index
    %c0_10 = arith.constant 0 : index
    %20 = vector.load %arg4[%c0_8, %c0_9, %c0_10] : memref<1x8x128xf32, #tpu.memory_space<vmem>>, vector<1x8x128xf32>
    tpu.vector_store %arg4[%c0_8, %c0_9, %c0_10], %19 {strides = array<i32>} : memref<1x8x128xf32, #tpu.memory_space<vmem>>, vector<1x8x128xf32>,
    return
  }
  func.func @transform_0(%arg0: i32, %arg1: i32) -> (i32, i32) {
    %c0_i32 = arith.constant 0 : i32
    return %arg0, %arg1 : i32, i32
  }
  func.func @transform_1(%arg0: i32, %arg1: i32) -> (i32, i32) {
    %c0_i32 = arith.constant 0 : i32
    return %arg0, %arg1 : i32, i32
  }
  func.func @transform_2(%arg0: i32, %arg1: i32) -> (i32, i32, i32) {
    %c0_i32 = arith.constant 0 : i32
    %c0_i32_0 = arith.constant 0 : i32
    %c0_i32_1 = arith.constant 0 : i32
    return %arg0, %c0_i32, %c0_i32_0 : i32, i32, i32
  }
}

</mosaic_0001>

<bundles_post_ra>
// kernel: tpu_custom_call.1
= control target key start
LH: loop header
LB: loop body
LE: loop exit
PB: predicated region body
PF: predicated region fallthrough
CT: control target
= control target key end

     0   :  { %7 = vsyncpa [#allocation5], 0  ;;  %s217_s0 = inlined_call_operand.hbm [shape: f32[8,256], index: 0, kind: input, shape index: {}]   ;;  %s218_s1 = inlined_call_operand.hbm [shape: f32[8,256], index: 1, kind: input, shape index: {}]   ;;  %s219_s2 = inlined_call_operand.hbm [shape: f32[1,8,128], index: 2, kind: output, shape index: {}]  }
   0x1   :  { %8 = vsyncpa [#allocation8], 0 }
   0x2   :  { %9 = vsyncpa [#allocation6], 0  ;;  %s163_s9 = smov [#allocation4]   ;;  %s164_s11 = smov [#allocation7]  }
   0x3   :  { %s16_s10 = sshll.u32 %s163_s9, 4  ;;  %s26_s12 = sshll.u32 %s164_s11, 4  ;;  %s17_s10 = int_to_ptr.vmem [resolvable:$true] %s16_s10  ;;  %s27_s12 = int_to_ptr.vmem [resolvable:$true] %s26_s12 }
   0x4   :  { %s91_s15 = scalar_lea.hbm %s217_s0, 256 }
   0x5   :  { %p92_p0 = scmp.ne.s32.totalorder %s217_s0, %s91_s15  ;;  %p95_p1 = scmp.lt.u32.totalorder %s91_s15, %s217_s0 }
   0x7   :  { %p97_p2 = pnand %p95_p1, %p92_p0 }
   0x9   :  { %100 = shalt.err (!%p97_p2)
}
   0xa   :  { %s101_s20 = scalar_lea.vmem %s17_s10, 256  ;;  %p106_p4 = scmp.lt.s32.totalorder %s17_s10, %s17_s10 }
   0xb   :  { %p102_p3 = scmp.ne.s32.totalorder %s17_s10, %s101_s20  ;;  %p107_p5 = scmp.lt.s32.totalorder %s101_s20, %s101_s20 }
   0xd   :  { %p108_p6 = por %p107_p5, %p106_p4 }
   0xf   :  { %p109_p7 = pnand %p108_p6, %p102_p3 }
  0x11   :  { %112 = shalt.err (!%p109_p7)
}
  0x12   :  { %19 = dma.hbm_to_vmem [thread:$0]  %s217_s0, 256, %s17_s10, [#allocation5]  }
  0x13   :  { %s113_s25 = scalar_lea.hbm %s218_s1, 256 }
  0x14   :  { %p114_p8 = scmp.ne.s32.totalorder %s218_s1, %s113_s25  ;;  %p117_p9 = scmp.lt.u32.totalorder %s113_s25, %s218_s1 }
  0x16   :  { %p119_p10 = pnand %p117_p9, %p114_p8 }
  0x18   :  { %122 = shalt.err (!%p119_p10)
}
  0x19   :  { %s123_s30 = scalar_lea.vmem %s27_s12, 256  ;;  %p128_p12 = scmp.lt.s32.totalorder %s27_s12, %s27_s12 }
  0x1a   :  { %p124_p11 = scmp.ne.s32.totalorder %s27_s12, %s123_s30  ;;  %p129_p13 = scmp.lt.s32.totalorder %s123_s30, %s123_s30 }
  0x1c   :  { %p130_p0 = por %p129_p13, %p128_p12 }
  0x1e   :  { %p131_p1 = pnand %p130_p0, %p124_p11 }
  0x20   :  { %134 = shalt.err (!%p131_p1)
}
  0x21   :  { %29 = dma.hbm_to_vmem [thread:$0]  %s218_s1, 256, %s27_s12, [#allocation8]  }
  0x22   :  { %157 = dma.done.wait [#allocation5], 256  }
  0x23   :  { %158 = vsyncadd [#allocation5], 4294967040 }
  0x24   :  { %159 = dma.done.wait [#allocation8], 256  }
  0x25   :  { %160 = vsyncadd [#allocation8], 4294967040  ;;  %v36_v0 = vld [vmem:[#allocation4] sm:$0xff]  ;;  %v37_v1 = vld [vmem:[#allocation4 + $0x8] sm:$0xff]  ;;  %vm55_vm0 = vcmask 7168   ;;  %s165_s1 = smov [#allocation9]  }
  0x26   :  { %v38_v2 = vld [vmem:[#allocation7] sm:$0xff]  ;;  %v39_v3 = vld [vmem:[#allocation7 + $0x8] sm:$0xff]  ;;  %s74_s4 = sshll.u32 %s165_s1, 4  ;;  %s75_s4 = int_to_ptr.vmem [resolvable:$true] %s74_s4 }
  0x27   :  { %v45_v4 = vadd.f32 %v38_v2, %v36_v0  ;;  %v46_v5 = vadd.f32 %v39_v3, %v37_v1  ;;  %v40_v6 = vmul.f32 %v38_v2, %v36_v0  ;;  %v41_v7 = vmul.f32 %v39_v3, %v37_v1  ;;  %s135_s6 = scalar_lea.vmem %s75_s4, 128  ;;  %p140_p3 = scmp.lt.s32.totalorder %s75_s4, %s75_s4 }
  0x28   :  { %p136_p2 = scmp.ne.s32.totalorder %s75_s4, %s135_s6  ;;  %p141_p4 = scmp.lt.s32.totalorder %s135_s6, %s135_s6 }
  0x29   :  { %v47_v8 = vadd.f32 %v46_v5, %v45_v4  ;;  %v42_v9 = vadd.f32 %v41_v7, %v40_v6 }
  0x2a   :  { %p142_p5 = por %p141_p4, %p140_p3 }
  0x2b   :  { %48 = vadd.xlane.f32.xlu0 %v47_v8 }
  0x2c   :  { %p143_p6 = pnand %p142_p5, %p136_p2 }
  0x2f   :  { %43 = vadd.xlane.f32.xlu0 %v42_v9 }
  0xb8   :  { %v49_v10 = vpop.xlane.xlu0 %48 }
  0xb9   :  { %v52_v11 = vadd.f32 1.0, %v49_v10 }
  0xbb   :  { %89 = vrcp.f32 %v52_v11 }
  0xbc   :  { %v44_v12 = vpop.xlane.xlu0 %43 }
  0xbd   :  { %v50_v13 = vmul.f32 2.0, %v44_v12 }
  0xbf   :  { %v51_v14 = vadd.f32 1.0, %v50_v13 }
  0xc5   :  { %v90_v15 = vpop.eup %89 }
  0xc6   :  { %v54_v16 = vmul.f32 %v90_v15, %v51_v14 }
  0xc8   :  { %v56_v17 = vsel %vm55_vm0, %v54_v16, 0.0 }
  0xc9   :  { %57 = vadd.xlane.f32.xlu1 %v56_v17 }
 0x156   :  { %v58_v18 = vpop.xlane.xlu1 %57 }
 0x157   :  { %v59_v19 = vrot.slane %v58_v18, 4 }
 0x159   :  { %v60_v20 = vadd.f32 %v59_v19, %v58_v18 }
 0x15b   :  { %v61_v21 = vrot.slane %v60_v20, 2 }
 0x15d   :  { %v62_v22 = vadd.f32 %v61_v21, %v60_v20 }
 0x15f   :  { %v63_v23 = vrot.slane %v62_v22, 1 }
 0x161   :  { %v64_v24 = vadd.f32 %v63_v23, %v62_v22 }
 0x163   :  { %84 = vpush %v64_v24 }
 0x194   :  { %s85_s5 = spop %84 }
 0x195   :  { %v66_v25 = vstv %s85_s5 }
 0x196   :  { %67 = vst [vmem:[#allocation9] sm:$0xff] %v66_v25 }
 0x197   :  { %146 = shalt.err (!%p143_p6)
}
 0x198   :  { %s147_s9 = scalar_lea.hbm %s219_s2, 128 }
 0x199   :  { %p148_p7 = scmp.ne.s32.totalorder %s219_s2, %s147_s9  ;;  %p151_p8 = scmp.lt.u32.totalorder %s147_s9, %s219_s2 }
 0x19b   :  { %p153_p9 = pnand %p151_p8, %p148_p7 }
 0x19d   :  { %156 = shalt.err (!%p153_p9)
}
 0x19e   :  { %77 = dma.vmem_to_hbm [thread:$0]  %s75_s4, 128, %s219_s2, [#allocation6]  }
 0x19f   :  { %161 = dma.done.wait [#allocation6], 128  }
 0x1a0   :  { %162 = vsyncadd [#allocation6], 4294967168 }
 0x1a1   :  { %81 = vsyncpa [#allocation5], 1 }
 0x1a2   :  { %82 = vsyncpa [#allocation8], 1 }
 0x1a3   :  { %83 = vsyncpa [#allocation6], 1 }

</bundles_post_ra>
